<compile_context>
chip_gen: v6e
topology: v6e:2x2x1
jax: 0.10.0
libtpu: 0.0.40
codegen_flags: <defaults>
</compile_context>

<pallas_src>
import math

import jax
import jax.numpy as jnp
from jax.experimental import pallas as pl
from jax.experimental.pallas import tpu as pltpu


def _round_up(n, m):
    return ((n + m - 1) // m) * m


# -----------------------------------------------------------------------------
# Kernel
# -----------------------------------------------------------------------------
def classify_kernel(x_ref, w1t_ref, w2t_ref, out_ref):
    # x_ref   : [TB, hidden_dim]        f32   (batch tile)
    # w1t_ref : [hidden_dim, MID_PAD]   bf16  (pre-transposed, zero-padded W1)
    # w2t_ref : [MID_PAD, C_PAD]        f32   (pre-transposed, zero-padded W2)
    # out_ref : [TB, C_PAD]             f32
    x = x_ref[...].astype(jnp.bfloat16)        # VPU cast, hides under DMA/MXU
    h = jnp.dot(x, w1t_ref[...], preferred_element_type=jnp.float32)
    h = jnp.maximum(h, 0.0)                    # ReLU in f32 (v5e-friendly)
    out_ref[...] = jnp.dot(h, w2t_ref[...], preferred_element_type=jnp.float32)


# -----------------------------------------------------------------------------
# One-time parameter preparation (call at model init and cache the result).
# -----------------------------------------------------------------------------
def prepare_classify_params(w1, w2):
    """w1: [64, hidden_dim], w2: [C, 64] (PyTorch nn.Linear weight layout).

    Returns (w1t bf16 [hidden_dim, MID_PAD], w2t f32 [MID_PAD, C_PAD], C).
    """
    mid, hidden_dim = w1.shape
    c, mid2 = w2.shape
    assert mid2 == mid
    mid_pad = _round_up(mid, 128)
    c_pad = _round_up(c, 128)
    w1t = jnp.zeros((hidden_dim, mid_pad), jnp.bfloat16)
    w1t = w1t.at[:, :mid].set(w1.T.astype(jnp.bfloat16))
    w2t = jnp.zeros((mid_pad, c_pad), jnp.float32)
    w2t = w2t.at[:mid, :c].set(w2.T.astype(jnp.float32))
    return w1t, w2t, c


def _choose_batch_tile(batch):
    """Big tiles to amortize per-grid-step overhead (~0.35 us), but keep >= 2
    grid steps once there is enough work so the 'parallel' batch axis can
    shard across v7x's two TensorCores."""
    tb = min(_round_up(batch, 8), 512)
    if batch >= 64 and pl.cdiv(batch, tb) < 2:
        tb = _round_up(pl.cdiv(batch, 2), 8)
    return tb


def _classify_call(feature, w1t, w2t, *, tb, weight_pipeline_mode):
    batch, hidden_dim = feature.shape
    mid_pad = w1t.shape[1]
    c_pad = w2t.shape[1]
    n_tiles = pl.cdiv(batch, tb)

    if weight_pipeline_mode is None:
        w1_spec = pl.BlockSpec((hidden_dim, mid_pad), lambda i: (0, 0))
        w2_spec = pl.BlockSpec((mid_pad, c_pad), lambda i: (0, 0))
    else:
        # Constant index_map -> weights never change across grid steps; single
        # buffering halves their resident VMEM footprint (matters if
        # hidden_dim grows, esp. on v7x's 64 MiB VMEM).
        w1_spec = pl.BlockSpec((hidden_dim, mid_pad), lambda i: (0, 0),
                               pipeline_mode=weight_pipeline_mode)
        w2_spec = pl.BlockSpec((mid_pad, c_pad), lambda i: (0, 0),
                               pipeline_mode=weight_pipeline_mode)

    flops = 2 * batch * (hidden_dim * mid_pad + mid_pad * c_pad)
    bytes_accessed = (feature.size * feature.dtype.itemsize
                      + w1t.size * 2 + w2t.size * 4 + batch * c_pad * 4)

    return pl.pallas_call(
        classify_kernel,
        out_shape=jax.ShapeDtypeStruct((batch, c_pad), jnp.float32),
        grid=(n_tiles,),
        in_specs=[
            pl.BlockSpec((tb, hidden_dim), lambda i: (i, 0)),   # batch tiles
            w1_spec,                                            # resident
            w2_spec,                                            # resident
        ],
        out_specs=pl.BlockSpec((tb, c_pad), lambda i: (i, 0)),
        compiler_params=pltpu.CompilerParams(
            dimension_semantics=("parallel",),
        ),
        cost_estimate=pl.CostEstimate(
            flops=flops, transcendentals=0, bytes_accessed=bytes_accessed),
    )(feature, w1t, w2t)


def classify_forward(feature, params):
    """feature: [B, hidden_dim] f32; params from prepare_classify_params.
    Returns [B, C] f32 (== L2(relu(L1(feature)))), bias-free."""
    w1t, w2t, c = params
    batch, hidden_dim = feature.shape
    assert w1t.shape[0] == hidden_dim
    tb = _choose_batch_tile(batch)
    try:
        out_padded = _classify_call(feature, w1t, w2t, tb=tb,
                                    weight_pipeline_mode=pl.Buffered(1))
    except Exception:
        # Fallback for JAX versions that reject single-buffered BlockSpecs.
        out_padded = _classify_call(feature, w1t, w2t, tb=tb,
                                    weight_pipeline_mode=None)
    return out_padded[:, :c]


# -----------------------------------------------------------------------------
# Init / references / test
# -----------------------------------------------------------------------------
def xavier_uniform(key, shape, dtype=jnp.float32):
    # Matches torch.nn.init.xavier_uniform_ for a 2D weight [fan_out, fan_in].
    fan_out, fan_in = shape
    bound = math.sqrt(6.0 / (fan_in + fan_out))
    return jax.random.uniform(key, shape, dtype=dtype, minval=-bound, maxval=bound)


def reference_forward_f32(feature, w1, w2):
    hp = jax.lax.Precision.HIGHEST
    h = jnp.maximum(jnp.dot(feature, w1.T, precision=hp), 0.0)
    return jnp.dot(h, w2.T, precision=hp)


def reference_forward_matched(feature, w1, w2):
    # Same bf16 rounding on the first-layer operands as the kernel; f32 math.
    hp = jax.lax.Precision.HIGHEST
    xb = feature.astype(jnp.bfloat16).astype(jnp.float32)
    w1b = w1.astype(jnp.bfloat16).astype(jnp.float32)
    h = jnp.maximum(jnp.dot(xb, w1b.T, precision=hp), 0.0)
    return jnp.dot(h, w2.T, precision=hp)


if __name__ == "__main__":
    hidden_dim = 256
    category_num = 28
    batch = 8

    key = jax.random.PRNGKey(0)
    k_x, k_w1, k_w2, k_x2 = jax.random.split(key, 4)

    feature = jax.random.normal(k_x, (batch, hidden_dim), dtype=jnp.float32)
    w1 = xavier_uniform(k_w1, (64, hidden_dim))       # L1.weight  [64, 256]
    w2 = xavier_uniform(k_w2, (category_num, 64))     # L2.weight  [28, 64]

    # One-time weight prep (transpose / pad / cast), cached across calls.
    params = prepare_classify_params(w1, w2)

    out = classify_forward(feature, params)
    out = jax.block_until_ready(out)
    assert out.shape == (batch, category_num)

    # Tight check vs. a reference using identical bf16-rounded L1 operands.
    ref_m = reference_forward_matched(feature, w1, w2)
    assert jnp.allclose(out, ref_m, atol=2e-3, rtol=2e-3), (
        float(jnp.max(jnp.abs(out - ref_m))))

    # Loose semantic check vs. the full-f32 PyTorch-equivalent reference.
    ref_f = reference_forward_f32(feature, w1, w2)
    assert jnp.allclose(out, ref_f, atol=5e-2, rtol=5e-2), (
        float(jnp.max(jnp.abs(out - ref_f))))

    # Ragged-batch case exercises the cdiv grid + masked last block.
    feature2 = jax.random.normal(k_x2, (13, hidden_dim), dtype=jnp.float32)
    out2 = jax.block_until_ready(classify_forward(feature2, params))
    assert out2.shape == (13, category_num)
    ref_m2 = reference_forward_matched(feature2, w1, w2)
    assert jnp.allclose(out2, ref_m2, atol=2e-3, rtol=2e-3), (
        float(jnp.max(jnp.abs(out2 - ref_m2))))

    print("KERNEL_OK")
</pallas_src>

<mosaic_0001>
module attributes {stable_mosaic.version = 11 : i64} {
  func.func @classify_kernel(%arg0: i32, %arg1: memref<8x256xf32, #tpu.memory_space<vmem>>, %arg2: memref<256x128xbf16, #tpu.memory_space<vmem>>, %arg3: memref<128x128xf32, #tpu.memory_space<vmem>>, %arg4: memref<8x128xf32, #tpu.memory_space<vmem>>) attributes {dimension_semantics = [#tpu.dimension_semantics<parallel>], iteration_bounds = array<i64: 1>, scalar_prefetch = 0 : i64, scratch_operands = 0 : i64, tpu.core_type = #tpu.core_type<tc>, window_params = [{transform_indices = @transform_0, window_bounds = array<i64: 8, 256>}, {pipeline_mode = #tpu.pipeline_mode<synchronous>, transform_indices = @transform_1, window_bounds = array<i64: 256, 128>}, {pipeline_mode = #tpu.pipeline_mode<synchronous>, transform_indices = @transform_2, window_bounds = array<i64: 128, 128>}, {transform_indices = @transform_3, window_bounds = array<i64: 8, 128>}]} {
    %c0 = arith.constant 0 : index
    %c0_0 = arith.constant 0 : index
    %0 = vector.load %arg1[%c0, %c0_0] : memref<8x256xf32, #tpu.memory_space<vmem>>, vector<8x256xf32>
    %1 = arith.truncf %0 : vector<8x256xf32> to vector<8x256xbf16>
    %c0_1 = arith.constant 0 : index
    %c0_2 = arith.constant 0 : index
    %2 = vector.load %arg2[%c0_1, %c0_2] : memref<256x128xbf16, #tpu.memory_space<vmem>>, vector<256x128xbf16>
    %cst = arith.constant dense<0.000000e+00> : vector<8x128xf32>
    %3 = tpu.matmul %1, %2, %cst {dimension_numbers = #tpu.dot_dimension_numbers<[1], [0], [0], [1], [0, 0, 1, 1], [], []>} : vector<8x256xbf16>, vector<256x128xbf16>, vector<8x128xf32> -> vector<8x128xf32>
    %cst_3 = arith.constant 0.000000e+00 : f32
    %4 = vector.broadcast %cst_3 : f32 to vector<8x128xf32>
    %5 = arith.maximumf %3, %4 : vector<8x128xf32>
    %c0_4 = arith.constant 0 : index
    %c0_5 = arith.constant 0 : index
    %6 = vector.load %arg3[%c0_4, %c0_5] : memref<128x128xf32, #tpu.memory_space<vmem>>, vector<128x128xf32>
    %cst_6 = arith.constant dense<0.000000e+00> : vector<8x128xf32>
    %7 = tpu.matmul %5, %6, %cst_6 {dimension_numbers = #tpu.dot_dimension_numbers<[1], [0], [0], [1], [0, 0, 1, 1], [], []>} : vector<8x128xf32>, vector<128x128xf32>, vector<8x128xf32> -> vector<8x128xf32>
    %c0_7 = arith.constant 0 : index
    %c0_8 = arith.constant 0 : index
    %8 = vector.load %arg4[%c0_7, %c0_8] : memref<8x128xf32, #tpu.memory_space<vmem>>, vector<8x128xf32>
    tpu.vector_store %arg4[%c0_7, %c0_8], %7 {strides = array<i32>} : memref<8x128xf32, #tpu.memory_space<vmem>>, vector<8x128xf32>,
    return
  }
  func.func @transform_0(%arg0: i32) -> (i32, i32) {
    %c0_i32 = arith.constant 0 : i32
    %c0_i32_0 = arith.constant 0 : i32
    return %arg0, %c0_i32 : i32, i32
  }
  func.func @transform_1(%arg0: i32) -> (i32, i32) {
    %c0_i32 = arith.constant 0 : i32
    %c0_i32_0 = arith.constant 0 : i32
    %c0_i32_1 = arith.constant 0 : i32
    return %c0_i32, %c0_i32_0 : i32, i32
  }
  func.func @transform_2(%arg0: i32) -> (i32, i32) {
    %c0_i32 = arith.constant 0 : i32
    %c0_i32_0 = arith.constant 0 : i32
    %c0_i32_1 = arith.constant 0 : i32
    return %c0_i32, %c0_i32_0 : i32, i32
  }
  func.func @transform_3(%arg0: i32) -> (i32, i32) {
    %c0_i32 = arith.constant 0 : i32
    %c0_i32_0 = arith.constant 0 : i32
    return %arg0, %c0_i32 : i32, i32
  }
}

module attributes {stable_mosaic.version = 11 : i64} {
  func.func @classify_kernel(%arg0: i32, %arg1: memref<8x256xf32, #tpu.memory_space<vmem>>, %arg2: memref<256x128xbf16, #tpu.memory_space<vmem>>, %arg3: memref<128x128xf32, #tpu.memory_space<vmem>>, %arg4: memref<8x128xf32, #tpu.memory_space<vmem>>) attributes {dimension_semantics = [#tpu.dimension_semantics<parallel>], iteration_bounds = array<i64: 1>, scalar_prefetch = 0 : i64, scratch_operands = 0 : i64, tpu.core_type = #tpu.core_type<tc>, window_params = [{transform_indices = @transform_0, window_bounds = array<i64: 8, 256>}, {pipeline_mode = #tpu.pipeline_mode<synchronous>, transform_indices = @transform_1, window_bounds = array<i64: 256, 128>}, {pipeline_mode = #tpu.pipeline_mode<synchronous>, transform_indices = @transform_2, window_bounds = array<i64: 128, 128>}, {transform_indices = @transform_3, window_bounds = array<i64: 8, 128>}]} {
    %c0 = arith.constant 0 : index
    %c0_0 = arith.constant 0 : index
    %0 = vector.load %arg1[%c0, %c0_0] : memref<8x256xf32, #tpu.memory_space<vmem>>, vector<8x256xf32>
    %1 = arith.truncf %0 : vector<8x256xf32> to vector<8x256xbf16>
    %c0_1 = arith.constant 0 : index
    %c0_2 = arith.constant 0 : index
    %2 = vector.load %arg2[%c0_1, %c0_2] : memref<256x128xbf16, #tpu.memory_space<vmem>>, vector<256x128xbf16>
    %cst = arith.constant dense<0.000000e+00> : vector<8x128xf32>
    %3 = tpu.matmul %1, %2, %cst {dimension_numbers = #tpu.dot_dimension_numbers<[1], [0], [0], [1], [0, 0, 1, 1], [], []>} : vector<8x256xbf16>, vector<256x128xbf16>, vector<8x128xf32> -> vector<8x128xf32>
    %cst_3 = arith.constant 0.000000e+00 : f32
    %4 = vector.broadcast %cst_3 : f32 to vector<8x128xf32>
    %5 = arith.maximumf %3, %4 : vector<8x128xf32>
    %c0_4 = arith.constant 0 : index
    %c0_5 = arith.constant 0 : index
    %6 = vector.load %arg3[%c0_4, %c0_5] : memref<128x128xf32, #tpu.memory_space<vmem>>, vector<128x128xf32>
    %cst_6 = arith.constant dense<0.000000e+00> : vector<8x128xf32>
    %7 = tpu.matmul %5, %6, %cst_6 {dimension_numbers = #tpu.dot_dimension_numbers<[1], [0], [0], [1], [0, 0, 1, 1], [], []>} : vector<8x128xf32>, vector<128x128xf32>, vector<8x128xf32> -> vector<8x128xf32>
    %c0_7 = arith.constant 0 : index
    %c0_8 = arith.constant 0 : index
    %8 = vector.load %arg4[%c0_7, %c0_8] : memref<8x128xf32, #tpu.memory_space<vmem>>, vector<8x128xf32>
    tpu.vector_store %arg4[%c0_7, %c0_8], %7 {strides = array<i32>} : memref<8x128xf32, #tpu.memory_space<vmem>>, vector<8x128xf32>,
    return
  }
  func.func @transform_0(%arg0: i32) -> (i32, i32) {
    %c0_i32 = arith.constant 0 : i32
    %c0_i32_0 = arith.constant 0 : i32
    return %arg0, %c0_i32 : i32, i32
  }
  func.func @transform_1(%arg0: i32) -> (i32, i32) {
    %c0_i32 = arith.constant 0 : i32
    %c0_i32_0 = arith.constant 0 : i32
    %c0_i32_1 = arith.constant 0 : i32
    return %c0_i32, %c0_i32_0 : i32, i32
  }
  func.func @transform_2(%arg0: i32) -> (i32, i32) {
    %c0_i32 = arith.constant 0 : i32
    %c0_i32_0 = arith.constant 0 : i32
    %c0_i32_1 = arith.constant 0 : i32
    return %c0_i32, %c0_i32_0 : i32, i32
  }
  func.func @transform_3(%arg0: i32) -> (i32, i32) {
    %c0_i32 = arith.constant 0 : i32
    %c0_i32_0 = arith.constant 0 : i32
    return %arg0, %c0_i32 : i32, i32
  }
}

</mosaic_0001>

<bundles_post_ra>
// kernel: tpu_custom_call.1
= control target key start
LH: loop header
LB: loop body
LE: loop exit
PB: predicated region body
PF: predicated region fallthrough
CT: control target
= control target key end

     0   :  { %8 = vsyncpa [#allocation3], 0  ;;  %s592_s0 = inlined_call_operand.hbm [shape: f32[8,256], index: 0, kind: input, shape index: {}]   ;;  %s593_s1 = inlined_call_operand.hbm [shape: bf16[256,128], index: 1, kind: input, shape index: {}]   ;;  %s594_s2 = inlined_call_operand.hbm [shape: f32[128,128], index: 2, kind: input, shape index: {}]   ;;  %s595_s3 = inlined_call_operand.hbm [shape: f32[8,128], index: 3, kind: output, shape index: {}]  }
   0x1   :  { %9 = vsyncpa [#allocation6], 0 }
   0x2   :  { %10 = vsyncpa [#allocation4], 0  ;;  %s533_s12 = smov [#allocation5]  }
   0x3   :  { %s26_s13 = sshll.u32 %s533_s12, 4  ;;  %s27_s13 = int_to_ptr.vmem [resolvable:$true] %s26_s13 }
   0x4   :  { %s455_s14 = scalar_lea.vmem %s27_s13, 2048  ;;  %p460_p1 = scmp.lt.s32.totalorder %s27_s13, %s27_s13 }
   0x5   :  { %p456_p0 = scmp.ne.s32.totalorder %s27_s13, %s455_s14  ;;  %p461_p2 = scmp.lt.s32.totalorder %s455_s14, %s455_s14 }
   0x7   :  { %p462_p3 = por %p461_p2, %p460_p1 }
   0x9   :  { %p463_p4 = pnand %p462_p3, %p456_p0 }
   0xb   :  { %466 = shalt.err (!%p463_p4)
}
   0xc   :  { %s534_s15 = smov 64   ;;  %s535_s16 = smov 4  }
   0xd   :  { %32 = dma.hbm_to_vmem [thread:$0]  %s593_s1, 2048, %s27_s13, [#allocation6], %s534_s15, %s534_s15, %s535_s16  }
   0xe   :  { %s536_s19 = smov [#allocation2]   ;;  %s537_s21 = smov [#allocation7]  }
   0xf   :  { %s17_s20 = sshll.u32 %s536_s19, 4  ;;  %s38_s22 = sshll.u32 %s537_s21, 4  ;;  %s18_s20 = int_to_ptr.vmem [resolvable:$true] %s17_s20  ;;  %s39_s22 = int_to_ptr.vmem [resolvable:$true] %s38_s22 }
  0x10   :  { %s475_s23 = scalar_lea.vmem %s18_s20, 256  ;;  %p480_p6 = scmp.lt.s32.totalorder %s18_s20, %s18_s20 }
  0x11   :  { %p476_p5 = scmp.ne.s32.totalorder %s18_s20, %s475_s23  ;;  %p481_p7 = scmp.lt.s32.totalorder %s475_s23, %s475_s23 }
  0x13   :  { %p482_p8 = por %p481_p7, %p480_p6 }
  0x15   :  { %p483_p9 = pnand %p482_p8, %p476_p5 }
  0x17   :  { %486 = shalt.err (!%p483_p9)
}
  0x18   :  { %20 = dma.hbm_to_vmem [thread:$0]  %s592_s0, 256, %s18_s20, [#allocation3]  }
  0x19   :  { %s495_s26 = scalar_lea.vmem %s39_s22, 2048  ;;  %p500_p11 = scmp.lt.s32.totalorder %s39_s22, %s39_s22 }
  0x1a   :  { %p496_p10 = scmp.ne.s32.totalorder %s39_s22, %s495_s26  ;;  %p501_p12 = scmp.lt.s32.totalorder %s495_s26, %s495_s26 }
  0x1c   :  { %p502_p13 = por %p501_p12, %p500_p11 }
  0x1e   :  { %p503_p0 = pnand %p502_p13, %p496_p10 }
  0x20   :  { %506 = shalt.err (!%p503_p0)
}
  0x21   :  { %s538_s1 = smov 128   ;;  %s539_s27 = smov 8  }
  0x22   :  { %44 = dma.hbm_to_vmem [thread:$0]  %s594_s2, 2048, %s39_s22, [#allocation6], %s538_s1, %s538_s1, %s539_s27  }
  0x23   :  { %527 = dma.done.wait [#allocation3], 256  }
  0x24   :  { %528 = vsyncadd [#allocation3], 4294967040 }
  0x25   :  { %529 = dma.done.wait [#allocation6], 4096  }
  0x26   :  { %530 = vsyncadd [#allocation6], 4294963200  ;;  %v540_v0 = vmov 0.0   ;;  %v431_v1 = vld [vmem:[#allocation5 + $0x78] sm:$0xff]   ;;  %v433_v3 = vld [vmem:[#allocation5 + $0x70] sm:$0xff]   ;;  %vm541_vm0 = vmmov 0  }
  0x27   :  { %386 = vmatprep.subr.mxu1 %v540_v0  ;;  %v432_v2 = vld [vmem:[#allocation5 + $0x38] sm:$0xff]   ;;  %347 = vmatprep.subr.bf16.mxu0 %v431_v1  ;;  %v434_v4 = vld [vmem:[#allocation5 + $0x30] sm:$0xff]   ;;  %v435_v5 = vld [vmem:[#allocation5 + $0x68] sm:$0xff]   ;;  %s542_s0 = smov [#allocation8]  }
  0x28   :  { %348 = vmatpush3.bf16.msra.mxu0 %v432_v2  ;;  %v436_v6 = vld [vmem:[#allocation5 + $0x28] sm:$0xff]   ;;  %v437_v7 = vld [vmem:[#allocation5 + $0x60] sm:$0xff]   ;;  %v439_v9 = vld [vmem:[#allocation5 + $0x58] sm:$0xff]   ;;  %418 = vmatprep.mubr.msk.f32.mxu1 %vm541_vm0, %v540_v0  ;;  %s321_s2 = sshll.u32 %s542_s0, 4  ;;  %s322_s2 = int_to_ptr.vmem [resolvable:$true] %s321_s2 }
  0x29   :  { %349 = vmatprep.subr.bf16.mxu0 %v433_v3  ;;  %v438_v8 = vld [vmem:[#allocation5 + $0x20] sm:$0xff]   ;;  %v440_v10 = vld [vmem:[#allocation5 + $0x18] sm:$0xff]   ;;  %v441_v11 = vld [vmem:[#allocation5 + $0x50] sm:$0xff]   ;;  %s507_s30 = scalar_lea.vmem %s322_s2, 128  ;;  %p512_p2 = scmp.lt.s32.totalorder %s322_s2, %s322_s2 }
  0x2a   :  { %v56_v12 = vld [vmem:[#allocation2 + $0x8] sm:$0xff]  ;;  %v242_v15 = vld [vmem:[#allocation7 + $0x70] sm:$0xff]  ;;  %v241_v17 = vld [vmem:[#allocation7 + $0x68] sm:$0xff]  ;;  %p508_p1 = scmp.ne.s32.totalorder %s322_s2, %s507_s30  ;;  %p513_p3 = scmp.lt.s32.totalorder %s507_s30, %s507_s30 }
  0x2b   :  { %v243_v13 = vld [vmem:[#allocation7 + $0x78] sm:$0xff]  ;;  %v58_v14 = vpack.c.bf16 %v56_v12, %v56_v12  ;;  %v442_v16 = vld [vmem:[#allocation5 + $0x10] sm:$0xff]   ;;  %v443_v18 = vld [vmem:[#allocation5 + $0x48] sm:$0xff]  }
  0x2c   :  { %350 = vmatpush3.bf16.msra.mxu0 %v434_v4  ;;  %387 = vmatpush3.msra.mxu1 %v243_v13  ;;  %v240_v19 = vld [vmem:[#allocation7 + $0x60] sm:$0xff]  ;;  %v444_v20 = vld [vmem:[#allocation5 + $0x8] sm:$0xff]   ;;  %v239_v21 = vld [vmem:[#allocation7 + $0x58] sm:$0xff]  ;;  %p514_p4 = por %p513_p3, %p512_p2 }
  0x2d   :  { %351 = vmatprep.subr.bf16.mxu0 %v435_v5  ;;  %388 = vmatprep.subr.mxu1 %v540_v0  ;;  %v445_v22 = vld [vmem:[#allocation5 + $0x40] sm:$0xff]   ;;  %v238_v23 = vld [vmem:[#allocation7 + $0x50] sm:$0xff]  ;;  %v237_v26 = vld [vmem:[#allocation7 + $0x48] sm:$0xff] }
  0x2e   :  { %219 = vmatprep.mubr.bf16.mxu0 %v58_v14  ;;  %389 = vmatpush3.msra.mxu1 %v242_v15  ;;  %v446_v24 = vld [vmem:[#allocation5] sm:$0xff]   ;;  %v55_v25 = vld [vmem:[#allocation2] sm:$0xff]  ;;  %v235_v29 = vld [vmem:[#allocation7 + $0x38] sm:$0xff]  ;;  %p515_p5 = pnand %p514_p4, %p508_p1 }
  0x2f   :  { %390 = vmatprep.subr.mxu1 %v540_v0  ;;  %v236_v27 = vld [vmem:[#allocation7 + $0x40] sm:$0xff]  ;;  %v57_v28 = vpack.c.bf16 %v55_v25, %v55_v25  ;;  %v234_v30 = vld [vmem:[#allocation7 + $0x30] sm:$0xff]  ;;  %v233_v31 = vld [vmem:[#allocation7 + $0x28] sm:$0xff] }
  0x30   :  { %352 = vmatpush3.bf16.msra.mxu0 %v436_v6  ;;  %391 = vmatpush3.msra.mxu1 %v241_v17  ;;  %v232_v32 = vld [vmem:[#allocation7 + $0x20] sm:$0xff]  ;;  %v231_v33 = vld [vmem:[#allocation7 + $0x18] sm:$0xff]  ;;  %v230_v34 = vld [vmem:[#allocation7 + $0x10] sm:$0xff] }
  0x31   :  { %353 = vmatprep.subr.bf16.mxu0 %v437_v7  ;;  %392 = vmatprep.subr.mxu1 %v540_v0  ;;  %v229_v35 = vld [vmem:[#allocation7 + $0x8] sm:$0xff]  ;;  %v228_v36 = vld [vmem:[#allocation7] sm:$0xff] }
  0x32   :  { %393 = vmatpush3.msra.mxu1 %v240_v19 }
  0x33   :  { %394 = vmatprep.subr.mxu1 %v540_v0 }
  0x34   :  { %354 = vmatpush3.bf16.msra.mxu0 %v438_v8  ;;  %395 = vmatpush3.msra.mxu1 %v239_v21 }
  0x35   :  { %355 = vmatprep.subr.bf16.mxu0 %v439_v9  ;;  %396 = vmatprep.subr.mxu1 %v540_v0 }
  0x36   :  { %397 = vmatpush3.msra.mxu1 %v238_v23 }
  0x37   :  { %398 = vmatprep.subr.mxu1 %v540_v0 }
  0x38   :  { %356 = vmatpush3.bf16.msra.mxu0 %v440_v10  ;;  %399 = vmatpush3.msra.mxu1 %v237_v26 }
  0x39   :  { %357 = vmatprep.subr.bf16.mxu0 %v441_v11  ;;  %400 = vmatprep.subr.mxu1 %v540_v0 }
  0x3a   :  { %401 = vmatpush3.msra.mxu1 %v236_v27 }
  0x3b   :  { %402 = vmatprep.subr.mxu1 %v540_v0 }
  0x3c   :  { %358 = vmatpush3.bf16.msra.mxu0 %v442_v16  ;;  %403 = vmatpush3.msra.mxu1 %v235_v29 }
  0x3d   :  { %359 = vmatprep.subr.bf16.mxu0 %v443_v18  ;;  %404 = vmatprep.subr.mxu1 %v540_v0 }
  0x3e   :  { %405 = vmatpush3.msra.mxu1 %v234_v30 }
  0x3f   :  { %406 = vmatprep.subr.mxu1 %v540_v0 }
  0x40   :  { %360 = vmatpush3.bf16.msra.mxu0 %v444_v20  ;;  %407 = vmatpush3.msra.mxu1 %v233_v31 }
  0x41   :  { %361 = vmatprep.subr.bf16.mxu0 %v445_v22  ;;  %408 = vmatprep.subr.mxu1 %v540_v0 }
  0x42   :  { %409 = vmatpush3.msra.mxu1 %v232_v32 }
  0x43   :  { %410 = vmatprep.subr.mxu1 %v540_v0 }
  0x44   :  { %362 = vmatpush3.bf16.msra.mxu0 %v446_v24  ;;  %411 = vmatpush3.msra.mxu1 %v231_v33 }
  0x45   :  { %412 = vmatprep.subr.mxu1 %v540_v0 }
  0x46   :  { %413 = vmatpush3.msra.mxu1 %v230_v34 }
  0x47   :  { %220 = vmatmul.mubr.bf16.vlgmr.msra.gmra.mxu0 %v57_v28  ;;  %414 = vmatprep.subr.mxu1 %v540_v0 }
  0x48   :  { %415 = vmatpush3.msra.mxu1 %v229_v35 }
  0x49   :  { %416 = vmatprep.subr.mxu1 %v540_v0 }
  0x4a   :  { %417 = vmatpush3.msra.mxu1 %v228_v36 }
 0x107   :  { %v363_v37 = vpop.f32.mrf.mxu0 }
 0x109   :  { %v364_v38 = vpop.f32.mrf.mxu0 }
 0x10a   :  { %v365_v39 = vadd.f32 %v364_v38, %v363_v37 }
 0x10b   :  { %v366_v40 = vpop.f32.mrf.mxu0 }
 0x10c   :  { %v227_v41 = vmax.f32 %v365_v39, 0.0 }
 0x10d   :  { %v367_v42 = vpop.f32.mrf.mxu0 }
 0x10e   :  { %419 = vmatmul.mubr.f32.vlgmr.msra.gmra.mxu1 %v227_v41 }
 0x1ce   :  { %v310_v43 = vpop.f32.mrf.mxu1 }
 0x1cf   :  { %314 = vst [vmem:[#allocation8] sm:$0xff] %v310_v43 }
 0x1d0   :  { %v420_v44 = vpop.f32.mrf.mxu1 }
 0x1d1   :  { %518 = shalt.err (!%p515_p5)
}
 0x1d2   :  { %324 = dma.vmem_to_hbm [thread:$0]  %s322_s2, 128, %s595_s3, [#allocation4]  }
 0x1d3   :  { %531 = dma.done.wait [#allocation4], 128  }
 0x1d4   :  { %532 = vsyncadd [#allocation4], 4294967168 }
 0x1d5   :  { %328 = vsyncpa [#allocation3], 1 }
 0x1d6   :  { %329 = vsyncpa [#allocation6], 1 }
 0x1d7   :  { %330 = vsyncpa [#allocation4], 1 }

// kernel: tpu_custom_call.1
= control target key start
LH: loop header
LB: loop body
LE: loop exit
PB: predicated region body
PF: predicated region fallthrough
CT: control target
= control target key end

     0   :  { %8 = vsyncpa [#allocation3], 0  ;;  %s592_s0 = inlined_call_operand.hbm [shape: f32[8,256], index: 0, kind: input, shape index: {}]   ;;  %s593_s1 = inlined_call_operand.hbm [shape: bf16[256,128], index: 1, kind: input, shape index: {}]   ;;  %s594_s2 = inlined_call_operand.hbm [shape: f32[128,128], index: 2, kind: input, shape index: {}]   ;;  %s595_s3 = inlined_call_operand.hbm [shape: f32[8,128], index: 3, kind: output, shape index: {}]  }
   0x1   :  { %9 = vsyncpa [#allocation6], 0 }
   0x2   :  { %10 = vsyncpa [#allocation4], 0  ;;  %s533_s12 = smov [#allocation5]  }
   0x3   :  { %s26_s13 = sshll.u32 %s533_s12, 4  ;;  %s27_s13 = int_to_ptr.vmem [resolvable:$true] %s26_s13 }
   0x4   :  { %s455_s14 = scalar_lea.vmem %s27_s13, 2048  ;;  %p460_p1 = scmp.lt.s32.totalorder %s27_s13, %s27_s13 }
   0x5   :  { %p456_p0 = scmp.ne.s32.totalorder %s27_s13, %s455_s14  ;;  %p461_p2 = scmp.lt.s32.totalorder %s455_s14, %s455_s14 }
   0x7   :  { %p462_p3 = por %p461_p2, %p460_p1 }
   0x9   :  { %p463_p4 = pnand %p462_p3, %p456_p0 }
   0xb   :  { %466 = shalt.err (!%p463_p4)
}
   0xc   :  { %s534_s15 = smov 64   ;;  %s535_s16 = smov 4  }
   0xd   :  { %32 = dma.hbm_to_vmem [thread:$0]  %s593_s1, 2048, %s27_s13, [#allocation6], %s534_s15, %s534_s15, %s535_s16  }
   0xe   :  { %s536_s19 = smov [#allocation2]   ;;  %s537_s21 = smov [#allocation7]  }
   0xf   :  { %s17_s20 = sshll.u32 %s536_s19, 4  ;;  %s38_s22 = sshll.u32 %s537_s21, 4  ;;  %s18_s20 = int_to_ptr.vmem [resolvable:$true] %s17_s20  ;;  %s39_s22 = int_to_ptr.vmem [resolvable:$true] %s38_s22 }
  0x10   :  { %s475_s23 = scalar_lea.vmem %s18_s20, 256  ;;  %p480_p6 = scmp.lt.s32.totalorder %s18_s20, %s18_s20 }
  0x11   :  { %p476_p5 = scmp.ne.s32.totalorder %s18_s20, %s475_s23  ;;  %p481_p7 = scmp.lt.s32.totalorder %s475_s23, %s475_s23 }
  0x13   :  { %p482_p8 = por %p481_p7, %p480_p6 }
  0x15   :  { %p483_p9 = pnand %p482_p8, %p476_p5 }
  0x17   :  { %486 = shalt.err (!%p483_p9)
}
  0x18   :  { %20 = dma.hbm_to_vmem [thread:$0]  %s592_s0, 256, %s18_s20, [#allocation3]  }
  0x19   :  { %s495_s26 = scalar_lea.vmem %s39_s22, 2048  ;;  %p500_p11 = scmp.lt.s32.totalorder %s39_s22, %s39_s22 }
  0x1a   :  { %p496_p10 = scmp.ne.s32.totalorder %s39_s22, %s495_s26  ;;  %p501_p12 = scmp.lt.s32.totalorder %s495_s26, %s495_s26 }
  0x1c   :  { %p502_p13 = por %p501_p12, %p500_p11 }
  0x1e   :  { %p503_p0 = pnand %p502_p13, %p496_p10 }
  0x20   :  { %506 = shalt.err (!%p503_p0)
}
  0x21   :  { %s538_s1 = smov 128   ;;  %s539_s27 = smov 8  }
  0x22   :  { %44 = dma.hbm_to_vmem [thread:$0]  %s594_s2, 2048, %s39_s22, [#allocation6], %s538_s1, %s538_s1, %s539_s27  }
  0x23   :  { %527 = dma.done.wait [#allocation3], 256  }
  0x24   :  { %528 = vsyncadd [#allocation3], 4294967040 }
  0x25   :  { %529 = dma.done.wait [#allocation6], 4096  }
  0x26   :  { %530 = vsyncadd [#allocation6], 4294963200  ;;  %v540_v0 = vmov 0.0   ;;  %v431_v1 = vld [vmem:[#allocation5 + $0x78] sm:$0xff]   ;;  %v433_v3 = vld [vmem:[#allocation5 + $0x70] sm:$0xff]   ;;  %vm541_vm0 = vmmov 0  }
  0x27   :  { %386 = vmatprep.subr.mxu1 %v540_v0  ;;  %v432_v2 = vld [vmem:[#allocation5 + $0x38] sm:$0xff]   ;;  %347 = vmatprep.subr.bf16.mxu0 %v431_v1  ;;  %v434_v4 = vld [vmem:[#allocation5 + $0x30] sm:$0xff]   ;;  %v435_v5 = vld [vmem:[#allocation5 + $0x68] sm:$0xff]   ;;  %s542_s0 = smov [#allocation8]  }
  0x28   :  { %348 = vmatpush3.bf16.msra.mxu0 %v432_v2  ;;  %v436_v6 = vld [vmem:[#allocation5 + $0x28] sm:$0xff]   ;;  %v437_v7 = vld [vmem:[#allocation5 + $0x60] sm:$0xff]   ;;  %v439_v9 = vld [vmem:[#allocation5 + $0x58] sm:$0xff]   ;;  %418 = vmatprep.mubr.msk.f32.mxu1 %vm541_vm0, %v540_v0  ;;  %s321_s2 = sshll.u32 %s542_s0, 4  ;;  %s322_s2 = int_to_ptr.vmem [resolvable:$true] %s321_s2 }
  0x29   :  { %349 = vmatprep.subr.bf16.mxu0 %v433_v3  ;;  %v438_v8 = vld [vmem:[#allocation5 + $0x20] sm:$0xff]   ;;  %v440_v10 = vld [vmem:[#allocation5 + $0x18] sm:$0xff]   ;;  %v441_v11 = vld [vmem:[#allocation5 + $0x50] sm:$0xff]   ;;  %s507_s30 = scalar_lea.vmem %s322_s2, 128  ;;  %p512_p2 = scmp.lt.s32.totalorder %s322_s2, %s322_s2 }
  0x2a   :  { %v56_v12 = vld [vmem:[#allocation2 + $0x8] sm:$0xff]  ;;  %v242_v15 = vld [vmem:[#allocation7 + $0x70] sm:$0xff]  ;;  %v241_v17 = vld [vmem:[#allocation7 + $0x68] sm:$0xff]  ;;  %p508_p1 = scmp.ne.s32.totalorder %s322_s2, %s507_s30  ;;  %p513_p3 = scmp.lt.s32.totalorder %s507_s30, %s507_s30 }
  0x2b   :  { %v243_v13 = vld [vmem:[#allocation7 + $0x78] sm:$0xff]  ;;  %v58_v14 = vpack.c.bf16 %v56_v12, %v56_v12  ;;  %v442_v16 = vld [vmem:[#allocation5 + $0x10] sm:$0xff]   ;;  %v443_v18 = vld [vmem:[#allocation5 + $0x48] sm:$0xff]  }
  0x2c   :  { %350 = vmatpush3.bf16.msra.mxu0 %v434_v4  ;;  %387 = vmatpush3.msra.mxu1 %v243_v13  ;;  %v240_v19 = vld [vmem:[#allocation7 + $0x60] sm:$0xff]  ;;  %v444_v20 = vld [vmem:[#allocation5 + $0x8] sm:$0xff]   ;;  %v239_v21 = vld [vmem:[#allocation7 + $0x58] sm:$0xff]  ;;  %p514_p4 = por %p513_p3, %p512_p2 }
  0x2d   :  { %351 = vmatprep.subr.bf16.mxu0 %v435_v5  ;;  %388 = vmatprep.subr.mxu1 %v540_v0  ;;  %v445_v22 = vld [vmem:[#allocation5 + $0x40] sm:$0xff]   ;;  %v238_v23 = vld [vmem:[#allocation7 + $0x50] sm:$0xff]  ;;  %v237_v26 = vld [vmem:[#allocation7 + $0x48] sm:$0xff] }
  0x2e   :  { %219 = vmatprep.mubr.bf16.mxu0 %v58_v14  ;;  %389 = vmatpush3.msra.mxu1 %v242_v15  ;;  %v446_v24 = vld [vmem:[#allocation5] sm:$0xff]   ;;  %v55_v25 = vld [vmem:[#allocation2] sm:$0xff]  ;;  %v235_v29 = vld [vmem:[#allocation7 + $0x38] sm:$0xff]  ;;  %p515_p5 = pnand %p514_p4, %p508_p1 }
  0x2f   :  { %390 = vmatprep.subr.mxu1 %v540_v0  ;;  %v236_v27 = vld [vmem:[#allocation7 + $0x40] sm:$0xff]  ;;  %v57_v28 = vpack.c.bf16 %v55_v25, %v55_v25  ;;  %v234_v30 = vld [vmem:[#allocation7 + $0x30] sm:$0xff]  ;;  %v233_v31 = vld [vmem:[#allocation7 + $0x28] sm:$0xff] }
  0x30   :  { %352 = vmatpush3.bf16.msra.mxu0 %v436_v6  ;;  %391 = vmatpush3.msra.mxu1 %v241_v17  ;;  %v232_v32 = vld [vmem:[#allocation7 + $0x20] sm:$0xff]  ;;  %v231_v33 = vld [vmem:[#allocation7 + $0x18] sm:$0xff]  ;;  %v230_v34 = vld [vmem:[#allocation7 + $0x10] sm:$0xff] }
  0x31   :  { %353 = vmatprep.subr.bf16.mxu0 %v437_v7  ;;  %392 = vmatprep.subr.mxu1 %v540_v0  ;;  %v229_v35 = vld [vmem:[#allocation7 + $0x8] sm:$0xff]  ;;  %v228_v36 = vld [vmem:[#allocation7] sm:$0xff] }
  0x32   :  { %393 = vmatpush3.msra.mxu1 %v240_v19 }
  0x33   :  { %394 = vmatprep.subr.mxu1 %v540_v0 }
  0x34   :  { %354 = vmatpush3.bf16.msra.mxu0 %v438_v8  ;;  %395 = vmatpush3.msra.mxu1 %v239_v21 }
  0x35   :  { %355 = vmatprep.subr.bf16.mxu0 %v439_v9  ;;  %396 = vmatprep.subr.mxu1 %v540_v0 }
  0x36   :  { %397 = vmatpush3.msra.mxu1 %v238_v23 }
  0x37   :  { %398 = vmatprep.subr.mxu1 %v540_v0 }
  0x38   :  { %356 = vmatpush3.bf16.msra.mxu0 %v440_v10  ;;  %399 = vmatpush3.msra.mxu1 %v237_v26 }
  0x39   :  { %357 = vmatprep.subr.bf16.mxu0 %v441_v11  ;;  %400 = vmatprep.subr.mxu1 %v540_v0 }
  0x3a   :  { %401 = vmatpush3.msra.mxu1 %v236_v27 }
  0x3b   :  { %402 = vmatprep.subr.mxu1 %v540_v0 }
  0x3c   :  { %358 = vmatpush3.bf16.msra.mxu0 %v442_v16  ;;  %403 = vmatpush3.msra.mxu1 %v235_v29 }
  0x3d   :  { %359 = vmatprep.subr.bf16.mxu0 %v443_v18  ;;  %404 = vmatprep.subr.mxu1 %v540_v0 }
  0x3e   :  { %405 = vmatpush3.msra.mxu1 %v234_v30 }
  0x3f   :  { %406 = vmatprep.subr.mxu1 %v540_v0 }
  0x40   :  { %360 = vmatpush3.bf16.msra.mxu0 %v444_v20  ;;  %407 = vmatpush3.msra.mxu1 %v233_v31 }
  0x41   :  { %361 = vmatprep.subr.bf16.mxu0 %v445_v22  ;;  %408 = vmatprep.subr.mxu1 %v540_v0 }
  0x42   :  { %409 = vmatpush3.msra.mxu1 %v232_v32 }
  0x43   :  { %410 = vmatprep.subr.mxu1 %v540_v0 }
  0x44   :  { %362 = vmatpush3.bf16.msra.mxu0 %v446_v24  ;;  %411 = vmatpush3.msra.mxu1 %v231_v33 }
  0x45   :  { %412 = vmatprep.subr.mxu1 %v540_v0 }
  0x46   :  { %413 = vmatpush3.msra.mxu1 %v230_v34 }
  0x47   :  { %220 = vmatmul.mubr.bf16.vlgmr.msra.gmra.mxu0 %v57_v28  ;;  %414 = vmatprep.subr.mxu1 %v540_v0 }
  0x48   :  { %415 = vmatpush3.msra.mxu1 %v229_v35 }
  0x49   :  { %416 = vmatprep.subr.mxu1 %v540_v0 }
  0x4a   :  { %417 = vmatpush3.msra.mxu1 %v228_v36 }
 0x107   :  { %v363_v37 = vpop.f32.mrf.mxu0 }
 0x109   :  { %v364_v38 = vpop.f32.mrf.mxu0 }
 0x10a   :  { %v365_v39 = vadd.f32 %v364_v38, %v363_v37 }
 0x10b   :  { %v366_v40 = vpop.f32.mrf.mxu0 }
 0x10c   :  { %v227_v41 = vmax.f32 %v365_v39, 0.0 }
 0x10d   :  { %v367_v42 = vpop.f32.mrf.mxu0 }
 0x10e   :  { %419 = vmatmul.mubr.f32.vlgmr.msra.gmra.mxu1 %v227_v41 }
 0x1ce   :  { %v310_v43 = vpop.f32.mrf.mxu1 }
 0x1cf   :  { %314 = vst [vmem:[#allocation8] sm:$0xff] %v310_v43 }
 0x1d0   :  { %v420_v44 = vpop.f32.mrf.mxu1 }
 0x1d1   :  { %518 = shalt.err (!%p515_p5)
}
 0x1d2   :  { %324 = dma.vmem_to_hbm [thread:$0]  %s322_s2, 128, %s595_s3, [#allocation4]  }
 0x1d3   :  { %531 = dma.done.wait [#allocation4], 128  }
 0x1d4   :  { %532 = vsyncadd [#allocation4], 4294967168 }
 0x1d5   :  { %328 = vsyncpa [#allocation3], 1 }
 0x1d6   :  { %329 = vsyncpa [#allocation6], 1 }
 0x1d7   :  { %330 = vsyncpa [#allocation4], 1 }

</bundles_post_ra>
